<compile_context>
chip_gen: v7x
topology: tpu7x:2x2x1
jax: 0.10.0
libtpu: 0.0.40
codegen_flags: <defaults>
</compile_context>

<pallas_src>
import functools

import jax
import jax.numpy as jnp
from jax import lax
from jax.experimental import pallas as pl
from jax.experimental.pallas import tpu as pltpu

# ----- LossComposer hyper-parameters (from __init__ defaults) -----
FOCAL_GAMMA = 4.0
FOCAL_ALPHA = (0.2, 1.0)   # per-class alpha
WEIGHT_BBOX = 1.0
WEIGHT_CLS = 1.0
WEIGHT_SIZE = 1.0
WEIGHT_SOG = 1.0           # unused in the original combined_loss (kept for parity)
WEIGHT_COG = 1.0
EPS = 1e-6

TARGET_SOG_INDEX = 8
TARGET_COG_INDEX = 9

LANES = 128
N_TERMS = 8                # [n_pos, cls, bbox, width, length, cog, sog_mix, size_mix]
TR_MAX = 1024              # row-tile target (512-1024 per review; also fits v7x's 64 MiB/TC)


def _pow_gamma(x, gamma):
    """(1-pt)^gamma: fast two-squarings path for the default gamma=4, generic
    exp/log fallback so changing FOCAL_GAMMA stays correct."""
    if float(gamma) == 4.0:
        x2 = x * x
        return x2 * x2
    if float(gamma) == 2.0:
        return x * x
    return jnp.exp(float(gamma) * jnp.log(jnp.maximum(x, EPS)))


def _loss_composer_kernel(pred_ref, targ_ref, acc_ref, *, stride, H, W,
                          tiles_per_core, n_tiles, n_cells, n_classes,
                          weight_size, has_padding):
    """Tiled loss kernel.

    pred_ref : (Cp, TR, 128) VMEM tile (native dtype; per-channel f32 cast)
    targ_ref : (Ct, TR, 128) VMEM tile
    acc_ref  : (1, 8, AR, 128) f32 output block == per-core partial-sum
               accumulator (block index depends only on the parallel axis, so
               it stays resident in VMEM across the whole row-tile loop).
    """
    f32 = jnp.float32
    p = pl.program_id(0)          # parallel (core) axis
    t = pl.program_id(1)          # row-tile axis ("arbitrary" / reduction)
    tr = pred_ref.shape[1]
    acc_rows = acc_ref.shape[2]
    tile_shape = (tr, LANES)

    @pl.when(t == 0)
    def _init():
        acc_ref[...] = jnp.zeros(acc_ref.shape, jnp.float32)

    # ---- per-cell grid coordinates synthesized in-kernel (no coords input) ----
    hw = H * W
    tile_cells = tr * LANES
    s_io = lax.broadcasted_iota(jnp.int32, tile_shape, 0)
    l_io = lax.broadcasted_iota(jnp.int32, tile_shape, 1)
    if (tile_cells % hw == 0) or (n_tiles == 1):
        base_mod = 0.0                                   # trace-time constant (common case)
    else:
        tile_idx = p * tiles_per_core + t
        # scalar-core int remainder keeps the vector math small & exact in f32
        base_mod = ((tile_idx * tile_cells) % hw).astype(f32)
    # cell index already reduced modulo one image: f32 math exact as long as
    # H*W + tile_cells < 2^24 (always true for realistic feature maps).
    cell = base_mod + s_io.astype(f32) * float(LANES) + l_io.astype(f32)
    inv_hw = 1.0 / float(hw)
    inv_w = 1.0 / float(W)
    img = jnp.floor(cell * inv_hw + 0.5 * inv_hw)
    cell = cell - img * float(hw)
    iy = jnp.floor(cell * inv_w + 0.5 * inv_w)           # cell row i
    jx = cell - iy * float(W)                            # cell col j

    if has_padding:
        # Only cls needs this: padded channels are explicit zeros, so the
        # objectness mask already kills every masked term in the pad region.
        tile_idx = p * tiles_per_core + t
        g = tile_idx * tile_cells + s_io * LANES + l_io  # exact int32 global index
        lane_valid = g < n_cells

    def pch(c):
        return pred_ref[c].astype(f32)                   # leading-dim slice, zero cost

    def tch(c):
        return targ_ref[c].astype(f32)

    def sigmoid(x):
        # exp-form: 2 VALU + 2 EUP (tanh form is 3 VALU + 1 EUP); VALU is the
        # binding VLIW slot on v7x / bf16-fed v6e while EUP has slack.
        return pl.reciprocal(1.0 + jnp.exp(-x), approx=True)

    # ---- objectness / positive-cell mask ----
    obj = tch(4)                                         # hoisted: reused as class-0 label
    mask = jnp.where(obj > 0.5, 1.0, 0.0)

    # ---- classification: focal BCE over class channels 4:6 ----
    # TODO(synk): ClassificationLoss was built with reduction='none'; reduced to a
    # mean over all cells here so the combined loss is a scalar.
    def focal(y, logit, alpha):
        pr = sigmoid(logit)
        pt = y * pr + (1.0 - y) * (1.0 - pr)
        at = y * alpha + (1.0 - y) * (1.0 - alpha)
        # max() instead of +eps keeps log() finite even if the approx reciprocal
        # pushes pr a hair above 1.
        return -(at * _pow_gamma(1.0 - pt, FOCAL_GAMMA) * jnp.log(jnp.maximum(pt, EPS)))

    cls_e = focal(obj, pch(4), FOCAL_ALPHA[0])           # seeded (no zeros + add)
    for c in range(1, n_classes):
        cls_e = cls_e + focal(tch(4 + c), pch(4 + c), FOCAL_ALPHA[c])
    if has_padding:
        cls_e = jnp.where(lane_valid, cls_e, 0.0)

    # ---- pred_and_target2bbox: decode per-cell boxes ----
    cx_t = (jx + tch(0)) * stride
    cy_t = (iy + tch(1)) * stride
    w_t = tch(2) * stride
    h_t = tch(3) * stride
    cx_p = (jx + sigmoid(pch(0))) * stride
    cy_p = (iy + sigmoid(pch(1))) * stride
    # clamp the exponent so stray large logits cannot inject inf/NaN into IoU
    w_p = jnp.exp(jnp.minimum(pch(2), 20.0)) * stride
    h_p = jnp.exp(jnp.minimum(pch(3), 20.0)) * stride

    # ---- bbox loss: GIoU, summed over positive cells ----
    x1_t, x2_t = cx_t - w_t * 0.5, cx_t + w_t * 0.5
    y1_t, y2_t = cy_t - h_t * 0.5, cy_t + h_t * 0.5
    x1_p, x2_p = cx_p - w_p * 0.5, cx_p + w_p * 0.5
    y1_p, y2_p = cy_p - h_p * 0.5, cy_p + h_p * 0.5
    inter_w = jnp.maximum(jnp.minimum(x2_t, x2_p) - jnp.maximum(x1_t, x1_p), 0.0)
    inter_h = jnp.maximum(jnp.minimum(y2_t, y2_p) - jnp.maximum(y1_t, y1_p), 0.0)
    inter = inter_w * inter_h
    union = w_t * h_t + w_p * h_p - inter + EPS
    iou = inter * pl.reciprocal(union, approx=True)
    cw = jnp.maximum(x2_t, x2_p) - jnp.minimum(x1_t, x1_p)
    ch = jnp.maximum(y2_t, y2_p) - jnp.minimum(y1_t, y1_p)
    c_area = cw * ch + EPS
    # TODO(synk): CIoU aspect-ratio (arctan) penalty omitted; GIoU variant used instead.
    giou = iou - (c_area - union) * pl.reciprocal(c_area, approx=True)
    bbox_e = mask * (1.0 - giou)

    # ---- size loss (per-element L1 on width / length) ----
    lw_e = jnp.abs(pch(6) - tch(6))
    ll_e = jnp.abs(pch(7) - tch(7))
    size_e = 0.5 * (lw_e + ll_e)

    # ---- sog loss (weighted speed loss, per-element) ----
    sog_d = pch(8) - tch(TARGET_SOG_INDEX)
    sog_e = sigmoid(pch(9)) * sog_d * sog_d

    # ---- cog loss (cos/sin MSE) ----
    d_cos = pch(10) - tch(TARGET_COG_INDEX)
    d_sin = pch(11) - tch(TARGET_COG_INDEX + 1)
    cog_e = d_cos * d_cos + d_sin * d_sin

    # 'none'-reduction mix branches (module scales BOTH by weight_size);
    # constant-folded at trace time when weight_size == 1 (size_mix == size_e).
    if float(weight_size) == 1.0:
        sog_mix = jnp.where(sog_e > 0.0, sog_e, size_e)
        size_mix = size_e
    else:
        sog_mix = jnp.where(sog_e > 0.0, weight_size * sog_e, size_e)
        size_mix = jnp.where(size_e > 0.0, weight_size * size_e, size_e)

    # ---- sublane-fold each term (tr,128)->(acc_rows,128) with pure VPU adds,
    #      accumulate into the tiny resident output block (no big scratch) ----
    def fold(x):
        if tr == acc_rows:
            return x
        return x.reshape(tr // acc_rows, acc_rows, LANES).sum(axis=0)

    terms = (mask, cls_e, bbox_e, mask * lw_e, mask * ll_e,
             mask * cog_e, mask * sog_mix, mask * size_mix)
    for i, term in enumerate(terms):
        acc_ref[0, i] += fold(term)


def _row_tiling(rows):
    """Row-tile size: full extent when small, else the largest multiple of 8
    <= TR_MAX that divides rows exactly (no ragged blocks, no padding)."""
    if rows <= TR_MAX:
        return rows, 1
    tr = TR_MAX
    while tr >= 8:
        if rows % tr == 0:
            return tr, rows // tr
        tr -= 8
    return None


def loss_composer_forward_from_slabs(pred_slab, targ_slab, *, stride, H, W, n_cells=None):
    """Producer-side entry point: inputs already in the kernel's native
    (C, rows, 128) lane-dense layout, so no relayout pass at all."""
    Cp, rows, lanes = pred_slab.shape
    Ct, rows_t, lanes_t = targ_slab.shape
    assert lanes == LANES and lanes_t == LANES and rows_t == rows
    if n_cells is None:
        n_cells = rows * LANES
    tiling = _row_tiling(rows)
    if tiling is None:
        raise ValueError(f"rows={rows} has no exact row tiling; pad rows to a multiple of {TR_MAX}")
    tr, n_tiles = tiling
    acc_rows = 8 if tr % 8 == 0 else tr

    # v7x dual-TensorCore split: leading 'parallel' axis, one partial-sum block
    # per core, summed in the XLA epilogue.  Harmless (size-1 / serial) on v5e/v6e.
    n_cores = 2 if (n_tiles >= 2 and n_tiles % 2 == 0) else 1
    tiles_per_core = n_tiles // n_cores

    n_classes = len(FOCAL_ALPHA)
    kernel = functools.partial(
        _loss_composer_kernel,
        stride=float(stride), H=H, W=W,
        tiles_per_core=tiles_per_core, n_tiles=n_tiles,
        n_cells=n_cells, n_classes=n_classes,
        weight_size=WEIGHT_SIZE, has_padding=(n_cells < rows * LANES))

    p_isz = pred_slab.dtype.itemsize
    t_isz = targ_slab.dtype.itemsize
    # double-buffered input tiles + the small resident partial-sum block
    vmem_needed = (2 * (Cp * p_isz + Ct * t_isz) * tr * LANES
                   + 2 * N_TERMS * acc_rows * LANES * 4)
    vmem_limit = min(max(int(vmem_needed * 1.25) + (1 << 20), 16 << 20), 48 << 20)

    padded_total = rows * LANES
    cost = pl.CostEstimate(
        flops=int(160 * padded_total),
        transcendentals=int(16 * padded_total),
        bytes_accessed=int((Cp * p_isz + Ct * t_isz) * padded_total
                           + n_cores * N_TERMS * acc_rows * LANES * 4),
    )

    partials = pl.pallas_call(
        kernel,
        out_shape=jax.ShapeDtypeStruct((n_cores, N_TERMS, acc_rows, LANES), jnp.float32),
        grid=(n_cores, tiles_per_core),
        in_specs=[
            pl.BlockSpec((Cp, tr, LANES), lambda p, t: (0, p * tiles_per_core + t, 0)),
            pl.BlockSpec((Ct, tr, LANES), lambda p, t: (0, p * tiles_per_core + t, 0)),
        ],
        out_specs=pl.BlockSpec((1, N_TERMS, acc_rows, LANES), lambda p, t: (p, 0, 0, 0)),
        compiler_params=pltpu.CompilerParams(
            dimension_semantics=("parallel", "arbitrary"),
            vmem_limit_bytes=vmem_limit,
        ),
        cost_estimate=cost,
    )(pred_slab, targ_slab)

    # ---- tiny XLA epilogue: collapse per-core partials, normalize, combine ----
    sums = jnp.sum(partials, axis=(0, 2, 3))             # (8,) raw sums
    n_pos = jnp.maximum(sums[0], 1.0)
    inv_pos = 1.0 / n_pos
    cls_loss = sums[1] / float(n_cells * n_classes)
    bbox_loss = sums[2]
    loss_width = sums[3] * inv_pos
    loss_length = sums[4] * inv_pos
    cog_loss = sums[5]
    sog_loss = sums[6] * inv_pos
    size_loss = sums[7] * inv_pos
    combined = (WEIGHT_BBOX * bbox_loss + WEIGHT_CLS * cls_loss
                + size_loss + sog_loss + WEIGHT_COG * cog_loss)
    return {
        "loss": combined,
        "bbox_loss_value": bbox_loss,
        "loss_width": loss_width,
        "loss_length": loss_length,
        "cls_loss_value": cls_loss,
        "size_loss_value": size_loss,
        "sog_loss_value": sog_loss,
        "cog_loss_value": cog_loss,
    }


def loss_composer_forward(prediction, target, stride: int = 4, image_size: int = 256,
                          *, compute_dtype=jnp.bfloat16):
    """prediction: (B, 12, H, W) NCHW; target: (B, 11, H, W) NCHW.

    compute_dtype is the DMA dtype fed to the kernel: bf16 (default) halves HBM
    traffic (the kernel is HBM-bound at f32 on v5e/v6e); accumulation stays f32
    in-kernel.  Pass jnp.float32 for full-fidelity evaluation.  image_size is
    unused (signature parity with the module).
    """
    del image_size
    B, Cp, H, W = prediction.shape
    _, Ct, _, _ = target.shape
    total = B * H * W

    rows = pl.cdiv(total, LANES)
    if rows > TR_MAX and _row_tiling(rows) is None:
        rows = pl.cdiv(rows, TR_MAX) * TR_MAX            # rare: force an exact tiling
    padded_total = rows * LANES

    def relayout(x, C):
        # Single layout pass: channels -> leading non-tiled dim, cells -> lane-dense
        # (rows, 128) slab, dtype cast fused into the same copy.  In production the
        # producer emits this layout directly -> use loss_composer_forward_from_slabs.
        x = jnp.transpose(x, (1, 0, 2, 3)).reshape(C, total)
        if padded_total != total:
            # TODO(synk): rare ragged-tail path (B*H*W not a multiple of 128) keeps a
            # separate pad copy; a producer-side padded slab removes it entirely.
            x = jnp.pad(x, ((0, 0), (0, padded_total - total)))
        return x.reshape(C, rows, LANES).astype(compute_dtype)

    pred3 = relayout(prediction, Cp)
    targ3 = relayout(target, Ct)
    return loss_composer_forward_from_slabs(pred3, targ3, stride=stride, H=H, W=W,
                                            n_cells=total)


if __name__ == "__main__":
    key = jax.random.PRNGKey(0)
    B, H, W = 2, 16, 16
    Cp, Ct = 12, 11
    k1, k2, k3 = jax.random.split(key, 3)

    prediction = jax.random.normal(k1, (B, Cp, H, W), dtype=jnp.float32)

    target = jax.random.normal(k2, (B, Ct, H, W), dtype=jnp.float32)
    # box offsets in [0,1), positive box sizes, positive physical sizes / sog
    target = target.at[:, 0:2].set(jax.nn.sigmoid(target[:, 0:2]))
    target = target.at[:, 2:4].set(jnp.abs(target[:, 2:4]) + 0.5)
    target = target.at[:, 6:9].set(jnp.abs(target[:, 6:9]) + 0.1)
    # objectness / class channels: ~30% positive cells
    obj = (jax.random.uniform(k3, (B, H, W)) > 0.7).astype(jnp.float32)
    target = target.at[:, 4].set(obj)
    target = target.at[:, 5].set(1.0 - obj)
    # cog as (cos, sin) of a random angle (target cog channels 9, 10)
    ang = jax.random.uniform(key, (B, H, W)) * 6.2831853
    target = target.at[:, 9].set(jnp.cos(ang))
    target = target.at[:, 10].set(jnp.sin(ang))

    loss_dict = loss_composer_forward(prediction, target, stride=4, image_size=64)
    jax.block_until_ready(loss_dict["loss"])

    assert all(bool(jnp.isfinite(v)) for v in loss_dict.values())
    print("KERNEL_OK")
</pallas_src>

<mosaic_0001>
module attributes {stable_mosaic.version = 11 : i64} {
  func.func @_loss_composer_kernel(%arg0: i32, %arg1: i32, %arg2: memref<12x4x128xbf16, #tpu.memory_space<vmem>>, %arg3: memref<11x4x128xbf16, #tpu.memory_space<vmem>>, %arg4: memref<1x8x4x128xf32, #tpu.memory_space<vmem>>) attributes {dimension_semantics = [#tpu.dimension_semantics<parallel>, #tpu.dimension_semantics<arbitrary>], iteration_bounds = array<i64: 1, 1>, scalar_prefetch = 0 : i64, scratch_operands = 0 : i64, tpu.core_type = #tpu.core_type<tc>, window_params = [{transform_indices = @transform_0, window_bounds = array<i64: 12, 4, 128>}, {transform_indices = @transform_1, window_bounds = array<i64: 11, 4, 128>}, {transform_indices = @transform_2, window_bounds = array<i64: 1, 8, 4, 128>}]} {
    %c0_i32 = arith.constant 0 : i32
    %0 = arith.cmpi eq, %arg1, %c0_i32 : i32
    %1 = arith.extui %0 : i1 to i32
    %c0_i32_0 = arith.constant 0 : i32
    %2 = arith.cmpi ne, %1, %c0_i32_0 : i32
    scf.if %2 {
      %cst_183 = arith.constant 0.000000e+00 : f32
      %339 = vector.broadcast %cst_183 : f32 to vector<1x8x4x128xf32>
      %c0_184 = arith.constant 0 : index
      %c0_185 = arith.constant 0 : index
      %c0_186 = arith.constant 0 : index
      %c0_187 = arith.constant 0 : index
      %340 = vector.load %arg4[%c0_184, %c0_185, %c0_186, %c0_187] : memref<1x8x4x128xf32, #tpu.memory_space<vmem>>, vector<1x8x4x128xf32>
      tpu.vector_store %arg4[%c0_184, %c0_185, %c0_186, %c0_187], %339 {strides = array<i32>} : memref<1x8x4x128xf32, #tpu.memory_space<vmem>>, vector<1x8x4x128xf32>,
    } else {
    }
    %3 = tpu.iota {dimensions = array<i32: 0>} : vector<4x128xi32>
    %4 = tpu.iota {dimensions = array<i32: 1>} : vector<4x128xi32>
    %5 = arith.sitofp %3 : vector<4x128xi32> to vector<4x128xf32>
    %cst = arith.constant 1.280000e+02 : f32
    %6 = vector.broadcast %cst : f32 to vector<4x128xf32>
    %7 = arith.mulf %5, %6 : vector<4x128xf32>
    %cst_1 = arith.constant 0.000000e+00 : f32
    %8 = vector.broadcast %cst_1 : f32 to vector<4x128xf32>
    %9 = arith.addf %8, %7 : vector<4x128xf32>
    %10 = arith.sitofp %4 : vector<4x128xi32> to vector<4x128xf32>
    %11 = arith.addf %9, %10 : vector<4x128xf32>
    %cst_2 = arith.constant 3.906250e-03 : f32
    %12 = vector.broadcast %cst_2 : f32 to vector<4x128xf32>
    %13 = arith.mulf %11, %12 : vector<4x128xf32>
    %cst_3 = arith.constant 0.001953125 : f32
    %14 = vector.broadcast %cst_3 : f32 to vector<4x128xf32>
    %15 = arith.addf %13, %14 : vector<4x128xf32>
    %16 = math.floor %15 : vector<4x128xf32>
    %cst_4 = arith.constant 2.560000e+02 : f32
    %17 = vector.broadcast %cst_4 : f32 to vector<4x128xf32>
    %18 = arith.mulf %16, %17 : vector<4x128xf32>
    %19 = arith.subf %11, %18 : vector<4x128xf32>
    %cst_5 = arith.constant 6.250000e-02 : f32
    %20 = vector.broadcast %cst_5 : f32 to vector<4x128xf32>
    %21 = arith.mulf %19, %20 : vector<4x128xf32>
    %cst_6 = arith.constant 3.125000e-02 : f32
    %22 = vector.broadcast %cst_6 : f32 to vector<4x128xf32>
    %23 = arith.addf %21, %22 : vector<4x128xf32>
    %24 = math.floor %23 : vector<4x128xf32>
    %cst_7 = arith.constant 1.600000e+01 : f32
    %25 = vector.broadcast %cst_7 : f32 to vector<4x128xf32>
    %26 = arith.mulf %24, %25 : vector<4x128xf32>
    %27 = arith.subf %19, %26 : vector<4x128xf32>
    %c4 = arith.constant 4 : index
    %c0 = arith.constant 0 : index
    %c0_8 = arith.constant 0 : index
    %28 = vector.load %arg3[%c4, %c0, %c0_8] : memref<11x4x128xbf16, #tpu.memory_space<vmem>>, vector<1x4x128xbf16>
    %29 = vector.shape_cast %28 : vector<1x4x128xbf16> to vector<4x128xbf16>
    %30 = arith.extf %29 : vector<4x128xbf16> to vector<4x128xf32>
    %cst_9 = arith.constant 5.000000e-01 : f32
    %31 = vector.broadcast %cst_9 : f32 to vector<4x128xf32>
    %32 = arith.cmpf ogt, %30, %31 : vector<4x128xf32>
    %cst_10 = arith.constant 1.000000e+00 : f32
    %cst_11 = arith.constant 0.000000e+00 : f32
    %33 = vector.broadcast %cst_10 : f32 to vector<4x128xf32>
    %34 = vector.broadcast %cst_11 : f32 to vector<4x128xf32>
    %35 = arith.select %32, %33, %34 : vector<4x128xi1>, vector<4x128xf32>
    %c4_12 = arith.constant 4 : index
    %c0_13 = arith.constant 0 : index
    %c0_14 = arith.constant 0 : index
    %36 = vector.load %arg2[%c4_12, %c0_13, %c0_14] : memref<12x4x128xbf16, #tpu.memory_space<vmem>>, vector<1x4x128xbf16>
    %37 = vector.shape_cast %36 : vector<1x4x128xbf16> to vector<4x128xbf16>
    %38 = arith.extf %37 : vector<4x128xbf16> to vector<4x128xf32>
    %cst_15 = arith.constant 0.000000e+00 : f32
    %39 = vector.broadcast %cst_15 : f32 to vector<4x128xf32>
    %40 = arith.subf %39, %38 : vector<4x128xf32>
    %41 = math.exp %40 : vector<4x128xf32>
    %cst_16 = arith.constant 1.000000e+00 : f32
    %42 = vector.broadcast %cst_16 : f32 to vector<4x128xf32>
    %43 = arith.addf %42, %41 : vector<4x128xf32>
    %44 = tpu.reciprocal %43 {approx = true} : vector<4x128xf32> -> vector<4x128xf32>
    %45 = arith.mulf %30, %44 : vector<4x128xf32>
    %cst_17 = arith.constant 1.000000e+00 : f32
    %46 = vector.broadcast %cst_17 : f32 to vector<4x128xf32>
    %47 = arith.subf %46, %30 : vector<4x128xf32>
    %cst_18 = arith.constant 1.000000e+00 : f32
    %48 = vector.broadcast %cst_18 : f32 to vector<4x128xf32>
    %49 = arith.subf %48, %44 : vector<4x128xf32>
    %50 = arith.mulf %47, %49 : vector<4x128xf32>
    %51 = arith.addf %45, %50 : vector<4x128xf32>
    %cst_19 = arith.constant 2.000000e-01 : f32
    %52 = vector.broadcast %cst_19 : f32 to vector<4x128xf32>
    %53 = arith.mulf %30, %52 : vector<4x128xf32>
    %cst_20 = arith.constant 1.000000e+00 : f32
    %54 = vector.broadcast %cst_20 : f32 to vector<4x128xf32>
    %55 = arith.subf %54, %30 : vector<4x128xf32>
    %cst_21 = arith.constant 8.000000e-01 : f32
    %56 = vector.broadcast %cst_21 : f32 to vector<4x128xf32>
    %57 = arith.mulf %55, %56 : vector<4x128xf32>
    %58 = arith.addf %53, %57 : vector<4x128xf32>
    %cst_22 = arith.constant 1.000000e+00 : f32
    %59 = vector.broadcast %cst_22 : f32 to vector<4x128xf32>
    %60 = arith.subf %59, %51 : vector<4x128xf32>
    %61 = arith.mulf %60, %60 : vector<4x128xf32>
    %62 = arith.mulf %61, %61 : vector<4x128xf32>
    %63 = arith.mulf %58, %62 : vector<4x128xf32>
    %cst_23 = arith.constant 9.99999997E-7 : f32
    %64 = vector.broadcast %cst_23 : f32 to vector<4x128xf32>
    %65 = arith.maximumf %51, %64 : vector<4x128xf32>
    %66 = math.log %65 : vector<4x128xf32>
    %67 = arith.mulf %63, %66 : vector<4x128xf32>
    %cst_24 = arith.constant 0.000000e+00 : f32
    %68 = vector.broadcast %cst_24 : f32 to vector<4x128xf32>
    %69 = arith.subf %68, %67 : vector<4x128xf32>
    %c5 = arith.constant 5 : index
    %c0_25 = arith.constant 0 : index
    %c0_26 = arith.constant 0 : index
    %70 = vector.load %arg3[%c5, %c0_25, %c0_26] : memref<11x4x128xbf16, #tpu.memory_space<vmem>>, vector<1x4x128xbf16>
    %71 = vector.shape_cast %70 : vector<1x4x128xbf16> to vector<4x128xbf16>
    %72 = arith.extf %71 : vector<4x128xbf16> to vector<4x128xf32>
    %c5_27 = arith.constant 5 : index
    %c0_28 = arith.constant 0 : index
    %c0_29 = arith.constant 0 : index
    %73 = vector.load %arg2[%c5_27, %c0_28, %c0_29] : memref<12x4x128xbf16, #tpu.memory_space<vmem>>, vector<1x4x128xbf16>
    %74 = vector.shape_cast %73 : vector<1x4x128xbf16> to vector<4x128xbf16>
    %75 = arith.extf %74 : vector<4x128xbf16> to vector<4x128xf32>
    %cst_30 = arith.constant 0.000000e+00 : f32
    %76 = vector.broadcast %cst_30 : f32 to vector<4x128xf32>
    %77 = arith.subf %76, %75 : vector<4x128xf32>
    %78 = math.exp %77 : vector<4x128xf32>
    %cst_31 = arith.constant 1.000000e+00 : f32
    %79 = vector.broadcast %cst_31 : f32 to vector<4x128xf32>
    %80 = arith.addf %79, %78 : vector<4x128xf32>
    %81 = tpu.reciprocal %80 {approx = true} : vector<4x128xf32> -> vector<4x128xf32>
    %82 = arith.mulf %72, %81 : vector<4x128xf32>
    %cst_32 = arith.constant 1.000000e+00 : f32
    %83 = vector.broadcast %cst_32 : f32 to vector<4x128xf32>
    %84 = arith.subf %83, %72 : vector<4x128xf32>
    %cst_33 = arith.constant 1.000000e+00 : f32
    %85 = vector.broadcast %cst_33 : f32 to vector<4x128xf32>
    %86 = arith.subf %85, %81 : vector<4x128xf32>
    %87 = arith.mulf %84, %86 : vector<4x128xf32>
    %88 = arith.addf %82, %87 : vector<4x128xf32>
    %cst_34 = arith.constant 1.000000e+00 : f32
    %89 = vector.broadcast %cst_34 : f32 to vector<4x128xf32>
    %90 = arith.mulf %72, %89 : vector<4x128xf32>
    %cst_35 = arith.constant 1.000000e+00 : f32
    %91 = vector.broadcast %cst_35 : f32 to vector<4x128xf32>
    %92 = arith.subf %91, %72 : vector<4x128xf32>
    %cst_36 = arith.constant 0.000000e+00 : f32
    %93 = vector.broadcast %cst_36 : f32 to vector<4x128xf32>
    %94 = arith.mulf %92, %93 : vector<4x128xf32>
    %95 = arith.addf %90, %94 : vector<4x128xf32>
    %cst_37 = arith.constant 1.000000e+00 : f32
    %96 = vector.broadcast %cst_37 : f32 to vector<4x128xf32>
    %97 = arith.subf %96, %88 : vector<4x128xf32>
    %98 = arith.mulf %97, %97 : vector<4x128xf32>
    %99 = arith.mulf %98, %98 : vector<4x128xf32>
    %100 = arith.mulf %95, %99 : vector<4x128xf32>
    %cst_38 = arith.constant 9.99999997E-7 : f32
    %101 = vector.broadcast %cst_38 : f32 to vector<4x128xf32>
    %102 = arith.maximumf %88, %101 : vector<4x128xf32>
    %103 = math.log %102 : vector<4x128xf32>
    %104 = arith.mulf %100, %103 : vector<4x128xf32>
    %cst_39 = arith.constant 0.000000e+00 : f32
    %105 = vector.broadcast %cst_39 : f32 to vector<4x128xf32>
    %106 = arith.subf %105, %104 : vector<4x128xf32>
    %107 = arith.addf %69, %106 : vector<4x128xf32>
    %c0_40 = arith.constant 0 : index
    %c0_41 = arith.constant 0 : index
    %c0_42 = arith.constant 0 : index
    %108 = vector.load %arg3[%c0_40, %c0_41, %c0_42] : memref<11x4x128xbf16, #tpu.memory_space<vmem>>, vector<1x4x128xbf16>
    %109 = vector.shape_cast %108 : vector<1x4x128xbf16> to vector<4x128xbf16>
    %110 = arith.extf %109 : vector<4x128xbf16> to vector<4x128xf32>
    %111 = arith.addf %27, %110 : vector<4x128xf32>
    %cst_43 = arith.constant 4.000000e+00 : f32
    %112 = vector.broadcast %cst_43 : f32 to vector<4x128xf32>
    %113 = arith.mulf %111, %112 : vector<4x128xf32>
    %c1 = arith.constant 1 : index
    %c0_44 = arith.constant 0 : index
    %c0_45 = arith.constant 0 : index
    %114 = vector.load %arg3[%c1, %c0_44, %c0_45] : memref<11x4x128xbf16, #tpu.memory_space<vmem>>, vector<1x4x128xbf16>
    %115 = vector.shape_cast %114 : vector<1x4x128xbf16> to vector<4x128xbf16>
    %116 = arith.extf %115 : vector<4x128xbf16> to vector<4x128xf32>
    %117 = arith.addf %24, %116 : vector<4x128xf32>
    %cst_46 = arith.constant 4.000000e+00 : f32
    %118 = vector.broadcast %cst_46 : f32 to vector<4x128xf32>
    %119 = arith.mulf %117, %118 : vector<4x128xf32>
    %c2 = arith.constant 2 : index
    %c0_47 = arith.constant 0 : index
    %c0_48 = arith.constant 0 : index
    %120 = vector.load %arg3[%c2, %c0_47, %c0_48] : memref<11x4x128xbf16, #tpu.memory_space<vmem>>, vector<1x4x128xbf16>
    %121 = vector.shape_cast %120 : vector<1x4x128xbf16> to vector<4x128xbf16>
    %122 = arith.extf %121 : vector<4x128xbf16> to vector<4x128xf32>
    %cst_49 = arith.constant 4.000000e+00 : f32
    %123 = vector.broadcast %cst_49 : f32 to vector<4x128xf32>
    %124 = arith.mulf %122, %123 : vector<4x128xf32>
    %c3 = arith.constant 3 : index
    %c0_50 = arith.constant 0 : index
    %c0_51 = arith.constant 0 : index
    %125 = vector.load %arg3[%c3, %c0_50, %c0_51] : memref<11x4x128xbf16, #tpu.memory_space<vmem>>, vector<1x4x128xbf16>
    %126 = vector.shape_cast %125 : vector<1x4x128xbf16> to vector<4x128xbf16>
    %127 = arith.extf %126 : vector<4x128xbf16> to vector<4x128xf32>
    %cst_52 = arith.constant 4.000000e+00 : f32
    %128 = vector.broadcast %cst_52 : f32 to vector<4x128xf32>
    %129 = arith.mulf %127, %128 : vector<4x128xf32>
    %c0_53 = arith.constant 0 : index
    %c0_54 = arith.constant 0 : index
    %c0_55 = arith.constant 0 : index
    %130 = vector.load %arg2[%c0_53, %c0_54, %c0_55] : memref<12x4x128xbf16, #tpu.memory_space<vmem>>, vector<1x4x128xbf16>
    %131 = vector.shape_cast %130 : vector<1x4x128xbf16> to vector<4x128xbf16>
    %132 = arith.extf %131 : vector<4x128xbf16> to vector<4x128xf32>
    %cst_56 = arith.constant 0.000000e+00 : f32
    %133 = vector.broadcast %cst_56 : f32 to vector<4x128xf32>
    %134 = arith.subf %133, %132 : vector<4x128xf32>
    %135 = math.exp %134 : vector<4x128xf32>
    %cst_57 = arith.constant 1.000000e+00 : f32
    %136 = vector.broadcast %cst_57 : f32 to vector<4x128xf32>
    %137 = arith.addf %136, %135 : vector<4x128xf32>
    %138 = tpu.reciprocal %137 {approx = true} : vector<4x128xf32> -> vector<4x128xf32>
    %139 = arith.addf %27, %138 : vector<4x128xf32>
    %cst_58 = arith.constant 4.000000e+00 : f32
    %140 = vector.broadcast %cst_58 : f32 to vector<4x128xf32>
    %141 = arith.mulf %139, %140 : vector<4x128xf32>
    %c1_59 = arith.constant 1 : index
    %c0_60 = arith.constant 0 : index
    %c0_61 = arith.constant 0 : index
    %142 = vector.load %arg2[%c1_59, %c0_60, %c0_61] : memref<12x4x128xbf16, #tpu.memory_space<vmem>>, vector<1x4x128xbf16>
    %143 = vector.shape_cast %142 : vector<1x4x128xbf16> to vector<4x128xbf16>
    %144 = arith.extf %143 : vector<4x128xbf16> to vector<4x128xf32>
    %cst_62 = arith.constant 0.000000e+00 : f32
    %145 = vector.broadcast %cst_62 : f32 to vector<4x128xf32>
    %146 = arith.subf %145, %144 : vector<4x128xf32>
    %147 = math.exp %146 : vector<4x128xf32>
    %cst_63 = arith.constant 1.000000e+00 : f32
    %148 = vector.broadcast %cst_63 : f32 to vector<4x128xf32>
    %149 = arith.addf %148, %147 : vector<4x128xf32>
    %150 = tpu.reciprocal %149 {approx = true} : vector<4x128xf32> -> vector<4x128xf32>
    %151 = arith.addf %24, %150 : vector<4x128xf32>
    %cst_64 = arith.constant 4.000000e+00 : f32
    %152 = vector.broadcast %cst_64 : f32 to vector<4x128xf32>
    %153 = arith.mulf %151, %152 : vector<4x128xf32>
    %c2_65 = arith.constant 2 : index
    %c0_66 = arith.constant 0 : index
    %c0_67 = arith.constant 0 : index
    %154 = vector.load %arg2[%c2_65, %c0_66, %c0_67] : memref<12x4x128xbf16, #tpu.memory_space<vmem>>, vector<1x4x128xbf16>
    %155 = vector.shape_cast %154 : vector<1x4x128xbf16> to vector<4x128xbf16>
    %156 = arith.extf %155 : vector<4x128xbf16> to vector<4x128xf32>
    %cst_68 = arith.constant 2.000000e+01 : f32
    %157 = vector.broadcast %cst_68 : f32 to vector<4x128xf32>
    %158 = arith.minimumf %156, %157 : vector<4x128xf32>
    %159 = math.exp %158 : vector<4x128xf32>
    %cst_69 = arith.constant 4.000000e+00 : f32
    %160 = vector.broadcast %cst_69 : f32 to vector<4x128xf32>
    %161 = arith.mulf %159, %160 : vector<4x128xf32>
    %c3_70 = arith.constant 3 : index
    %c0_71 = arith.constant 0 : index
    %c0_72 = arith.constant 0 : index
    %162 = vector.load %arg2[%c3_70, %c0_71, %c0_72] : memref<12x4x128xbf16, #tpu.memory_space<vmem>>, vector<1x4x128xbf16>
    %163 = vector.shape_cast %162 : vector<1x4x128xbf16> to vector<4x128xbf16>
    %164 = arith.extf %163 : vector<4x128xbf16> to vector<4x128xf32>
    %cst_73 = arith.constant 2.000000e+01 : f32
    %165 = vector.broadcast %cst_73 : f32 to vector<4x128xf32>
    %166 = arith.minimumf %164, %165 : vector<4x128xf32>
    %167 = math.exp %166 : vector<4x128xf32>
    %cst_74 = arith.constant 4.000000e+00 : f32
    %168 = vector.broadcast %cst_74 : f32 to vector<4x128xf32>
    %169 = arith.mulf %167, %168 : vector<4x128xf32>
    %cst_75 = arith.constant 5.000000e-01 : f32
    %170 = vector.broadcast %cst_75 : f32 to vector<4x128xf32>
    %171 = arith.mulf %124, %170 : vector<4x128xf32>
    %172 = arith.subf %113, %171 : vector<4x128xf32>
    %cst_76 = arith.constant 5.000000e-01 : f32
    %173 = vector.broadcast %cst_76 : f32 to vector<4x128xf32>
    %174 = arith.mulf %124, %173 : vector<4x128xf32>
    %175 = arith.addf %113, %174 : vector<4x128xf32>
    %cst_77 = arith.constant 5.000000e-01 : f32
    %176 = vector.broadcast %cst_77 : f32 to vector<4x128xf32>
    %177 = arith.mulf %129, %176 : vector<4x128xf32>
    %178 = arith.subf %119, %177 : vector<4x128xf32>
    %cst_78 = arith.constant 5.000000e-01 : f32
    %179 = vector.broadcast %cst_78 : f32 to vector<4x128xf32>
    %180 = arith.mulf %129, %179 : vector<4x128xf32>
    %181 = arith.addf %119, %180 : vector<4x128xf32>
    %cst_79 = arith.constant 5.000000e-01 : f32
    %182 = vector.broadcast %cst_79 : f32 to vector<4x128xf32>
    %183 = arith.mulf %161, %182 : vector<4x128xf32>
    %184 = arith.subf %141, %183 : vector<4x128xf32>
    %cst_80 = arith.constant 5.000000e-01 : f32
    %185 = vector.broadcast %cst_80 : f32 to vector<4x128xf32>
    %186 = arith.mulf %161, %185 : vector<4x128xf32>
    %187 = arith.addf %141, %186 : vector<4x128xf32>
    %cst_81 = arith.constant 5.000000e-01 : f32
    %188 = vector.broadcast %cst_81 : f32 to vector<4x128xf32>
    %189 = arith.mulf %169, %188 : vector<4x128xf32>
    %190 = arith.subf %153, %189 : vector<4x128xf32>
    %cst_82 = arith.constant 5.000000e-01 : f32
    %191 = vector.broadcast %cst_82 : f32 to vector<4x128xf32>
    %192 = arith.mulf %169, %191 : vector<4x128xf32>
    %193 = arith.addf %153, %192 : vector<4x128xf32>
    %194 = arith.minimumf %175, %187 : vector<4x128xf32>
    %195 = arith.maximumf %172, %184 : vector<4x128xf32>
    %196 = arith.subf %194, %195 : vector<4x128xf32>
    %cst_83 = arith.constant 0.000000e+00 : f32
    %197 = vector.broadcast %cst_83 : f32 to vector<4x128xf32>
    %198 = arith.maximumf %196, %197 : vector<4x128xf32>
    %199 = arith.minimumf %181, %193 : vector<4x128xf32>
    %200 = arith.maximumf %178, %190 : vector<4x128xf32>
    %201 = arith.subf %199, %200 : vector<4x128xf32>
    %cst_84 = arith.constant 0.000000e+00 : f32
    %202 = vector.broadcast %cst_84 : f32 to vector<4x128xf32>
    %203 = arith.maximumf %201, %202 : vector<4x128xf32>
    %204 = arith.mulf %198, %203 : vector<4x128xf32>
    %205 = arith.mulf %124, %129 : vector<4x128xf32>
    %206 = arith.mulf %161, %169 : vector<4x128xf32>
    %207 = arith.addf %205, %206 : vector<4x128xf32>
    %208 = arith.subf %207, %204 : vector<4x128xf32>
    %cst_85 = arith.constant 9.99999997E-7 : f32
    %209 = vector.broadcast %cst_85 : f32 to vector<4x128xf32>
    %210 = arith.addf %208, %209 : vector<4x128xf32>
    %211 = tpu.reciprocal %210 {approx = true} : vector<4x128xf32> -> vector<4x128xf32>
    %212 = arith.mulf %204, %211 : vector<4x128xf32>
    %213 = arith.maximumf %175, %187 : vector<4x128xf32>
    %214 = arith.minimumf %172, %184 : vector<4x128xf32>
    %215 = arith.subf %213, %214 : vector<4x128xf32>
    %216 = arith.maximumf %181, %193 : vector<4x128xf32>
    %217 = arith.minimumf %178, %190 : vector<4x128xf32>
    %218 = arith.subf %216, %217 : vector<4x128xf32>
    %219 = arith.mulf %215, %218 : vector<4x128xf32>
    %cst_86 = arith.constant 9.99999997E-7 : f32
    %220 = vector.broadcast %cst_86 : f32 to vector<4x128xf32>
    %221 = arith.addf %219, %220 : vector<4x128xf32>
    %222 = arith.subf %221, %210 : vector<4x128xf32>
    %223 = tpu.reciprocal %221 {approx = true} : vector<4x128xf32> -> vector<4x128xf32>
    %224 = arith.mulf %222, %223 : vector<4x128xf32>
    %225 = arith.subf %212, %224 : vector<4x128xf32>
    %cst_87 = arith.constant 1.000000e+00 : f32
    %226 = vector.broadcast %cst_87 : f32 to vector<4x128xf32>
    %227 = arith.subf %226, %225 : vector<4x128xf32>
    %228 = arith.mulf %35, %227 : vector<4x128xf32>
    %c6 = arith.constant 6 : index
    %c0_88 = arith.constant 0 : index
    %c0_89 = arith.constant 0 : index
    %229 = vector.load %arg2[%c6, %c0_88, %c0_89] : memref<12x4x128xbf16, #tpu.memory_space<vmem>>, vector<1x4x128xbf16>
    %230 = vector.shape_cast %229 : vector<1x4x128xbf16> to vector<4x128xbf16>
    %231 = arith.extf %230 : vector<4x128xbf16> to vector<4x128xf32>
    %c6_90 = arith.constant 6 : index
    %c0_91 = arith.constant 0 : index
    %c0_92 = arith.constant 0 : index
    %232 = vector.load %arg3[%c6_90, %c0_91, %c0_92] : memref<11x4x128xbf16, #tpu.memory_space<vmem>>, vector<1x4x128xbf16>
    %233 = vector.shape_cast %232 : vector<1x4x128xbf16> to vector<4x128xbf16>
    %234 = arith.extf %233 : vector<4x128xbf16> to vector<4x128xf32>
    %235 = arith.subf %231, %234 : vector<4x128xf32>
    %236 = math.absf %235 : vector<4x128xf32>
    %c7 = arith.constant 7 : index
    %c0_93 = arith.constant 0 : index
    %c0_94 = arith.constant 0 : index
    %237 = vector.load %arg2[%c7, %c0_93, %c0_94] : memref<12x4x128xbf16, #tpu.memory_space<vmem>>, vector<1x4x128xbf16>
    %238 = vector.shape_cast %237 : vector<1x4x128xbf16> to vector<4x128xbf16>
    %239 = arith.extf %238 : vector<4x128xbf16> to vector<4x128xf32>
    %c7_95 = arith.constant 7 : index
    %c0_96 = arith.constant 0 : index
    %c0_97 = arith.constant 0 : index
    %240 = vector.load %arg3[%c7_95, %c0_96, %c0_97] : memref<11x4x128xbf16, #tpu.memory_space<vmem>>, vector<1x4x128xbf16>
    %241 = vector.shape_cast %240 : vector<1x4x128xbf16> to vector<4x128xbf16>
    %242 = arith.extf %241 : vector<4x128xbf16> to vector<4x128xf32>
    %243 = arith.subf %239, %242 : vector<4x128xf32>
    %244 = math.absf %243 : vector<4x128xf32>
    %245 = arith.addf %236, %244 : vector<4x128xf32>
    %cst_98 = arith.constant 5.000000e-01 : f32
    %246 = vector.broadcast %cst_98 : f32 to vector<4x128xf32>
    %247 = arith.mulf %246, %245 : vector<4x128xf32>
    %c8 = arith.constant 8 : index
    %c0_99 = arith.constant 0 : index
    %c0_100 = arith.constant 0 : index
    %248 = vector.load %arg2[%c8, %c0_99, %c0_100] : memref<12x4x128xbf16, #tpu.memory_space<vmem>>, vector<1x4x128xbf16>
    %249 = vector.shape_cast %248 : vector<1x4x128xbf16> to vector<4x128xbf16>
    %250 = arith.extf %249 : vector<4x128xbf16> to vector<4x128xf32>
    %c8_101 = arith.constant 8 : index
    %c0_102 = arith.constant 0 : index
    %c0_103 = arith.constant 0 : index
    %251 = vector.load %arg3[%c8_101, %c0_102, %c0_103] : memref<11x4x128xbf16, #tpu.memory_space<vmem>>, vector<1x4x128xbf16>
    %252 = vector.shape_cast %251 : vector<1x4x128xbf16> to vector<4x128xbf16>
    %253 = arith.extf %252 : vector<4x128xbf16> to vector<4x128xf32>
    %254 = arith.subf %250, %253 : vector<4x128xf32>
    %c9 = arith.constant 9 : index
    %c0_104 = arith.constant 0 : index
    %c0_105 = arith.constant 0 : index
    %255 = vector.load %arg2[%c9, %c0_104, %c0_105] : memref<12x4x128xbf16, #tpu.memory_space<vmem>>, vector<1x4x128xbf16>
    %256 = vector.shape_cast %255 : vector<1x4x128xbf16> to vector<4x128xbf16>
    %257 = arith.extf %256 : vector<4x128xbf16> to vector<4x128xf32>
    %cst_106 = arith.constant 0.000000e+00 : f32
    %258 = vector.broadcast %cst_106 : f32 to vector<4x128xf32>
    %259 = arith.subf %258, %257 : vector<4x128xf32>
    %260 = math.exp %259 : vector<4x128xf32>
    %cst_107 = arith.constant 1.000000e+00 : f32
    %261 = vector.broadcast %cst_107 : f32 to vector<4x128xf32>
    %262 = arith.addf %261, %260 : vector<4x128xf32>
    %263 = tpu.reciprocal %262 {approx = true} : vector<4x128xf32> -> vector<4x128xf32>
    %264 = arith.mulf %263, %254 : vector<4x128xf32>
    %265 = arith.mulf %264, %254 : vector<4x128xf32>
    %c10 = arith.constant 10 : index
    %c0_108 = arith.constant 0 : index
    %c0_109 = arith.constant 0 : index
    %266 = vector.load %arg2[%c10, %c0_108, %c0_109] : memref<12x4x128xbf16, #tpu.memory_space<vmem>>, vector<1x4x128xbf16>
    %267 = vector.shape_cast %266 : vector<1x4x128xbf16> to vector<4x128xbf16>
    %268 = arith.extf %267 : vector<4x128xbf16> to vector<4x128xf32>
    %c9_110 = arith.constant 9 : index
    %c0_111 = arith.constant 0 : index
    %c0_112 = arith.constant 0 : index
    %269 = vector.load %arg3[%c9_110, %c0_111, %c0_112] : memref<11x4x128xbf16, #tpu.memory_space<vmem>>, vector<1x4x128xbf16>
    %270 = vector.shape_cast %269 : vector<1x4x128xbf16> to vector<4x128xbf16>
    %271 = arith.extf %270 : vector<4x128xbf16> to vector<4x128xf32>
    %272 = arith.subf %268, %271 : vector<4x128xf32>
    %c11 = arith.constant 11 : index
    %c0_113 = arith.constant 0 : index
    %c0_114 = arith.constant 0 : index
    %273 = vector.load %arg2[%c11, %c0_113, %c0_114] : memref<12x4x128xbf16, #tpu.memory_space<vmem>>, vector<1x4x128xbf16>
    %274 = vector.shape_cast %273 : vector<1x4x128xbf16> to vector<4x128xbf16>
    %275 = arith.extf %274 : vector<4x128xbf16> to vector<4x128xf32>
    %c10_115 = arith.constant 10 : index
    %c0_116 = arith.constant 0 : index
    %c0_117 = arith.constant 0 : index
    %276 = vector.load %arg3[%c10_115, %c0_116, %c0_117] : memref<11x4x128xbf16, #tpu.memory_space<vmem>>, vector<1x4x128xbf16>
    %277 = vector.shape_cast %276 : vector<1x4x128xbf16> to vector<4x128xbf16>
    %278 = arith.extf %277 : vector<4x128xbf16> to vector<4x128xf32>
    %279 = arith.subf %275, %278 : vector<4x128xf32>
    %280 = arith.mulf %272, %272 : vector<4x128xf32>
    %281 = arith.mulf %279, %279 : vector<4x128xf32>
    %282 = arith.addf %280, %281 : vector<4x128xf32>
    %cst_118 = arith.constant 0.000000e+00 : f32
    %283 = vector.broadcast %cst_118 : f32 to vector<4x128xf32>
    %284 = arith.cmpf ogt, %265, %283 : vector<4x128xf32>
    %285 = arith.select %284, %265, %247 : vector<4x128xi1>, vector<4x128xf32>
    %286 = arith.mulf %35, %236 : vector<4x128xf32>
    %287 = arith.mulf %35, %244 : vector<4x128xf32>
    %288 = arith.mulf %35, %282 : vector<4x128xf32>
    %289 = arith.mulf %35, %285 : vector<4x128xf32>
    %290 = arith.mulf %35, %247 : vector<4x128xf32>
    %c0_119 = arith.constant 0 : index
    %c0_120 = arith.constant 0 : index
    %c0_121 = arith.constant 0 : index
    %c0_122 = arith.constant 0 : index
    %291 = vector.load %arg4[%c0_119, %c0_120, %c0_121, %c0_122] : memref<1x8x4x128xf32, #tpu.memory_space<vmem>>, vector<1x1x4x128xf32>
    %292 = vector.shape_cast %291 : vector<1x1x4x128xf32> to vector<4x128xf32>
    %293 = arith.addf %292, %35 : vector<4x128xf32>
    %c0_123 = arith.constant 0 : index
    %c0_124 = arith.constant 0 : index
    %c0_125 = arith.constant 0 : index
    %c0_126 = arith.constant 0 : index
    %294 = vector.load %arg4[%c0_123, %c0_124, %c0_125, %c0_126] : memref<1x8x4x128xf32, #tpu.memory_space<vmem>>, vector<1x1x4x128xf32>
    %295 = vector.shape_cast %294 : vector<1x1x4x128xf32> to vector<4x128xf32>
    %296 = vector.shape_cast %293 : vector<4x128xf32> to vector<1x1x4x128xf32>
    tpu.vector_store %arg4[%c0_123, %c0_124, %c0_125, %c0_126], %296 {strides = array<i32>} : memref<1x8x4x128xf32, #tpu.memory_space<vmem>>, vector<1x1x4x128xf32>,
    %c0_127 = arith.constant 0 : index
    %c1_128 = arith.constant 1 : index
    %c0_129 = arith.constant 0 : index
    %c0_130 = arith.constant 0 : index
    %297 = vector.load %arg4[%c0_127, %c1_128, %c0_129, %c0_130] : memref<1x8x4x128xf32, #tpu.memory_space<vmem>>, vector<1x1x4x128xf32>
    %298 = vector.shape_cast %297 : vector<1x1x4x128xf32> to vector<4x128xf32>
    %299 = arith.addf %298, %107 : vector<4x128xf32>
    %c0_131 = arith.constant 0 : index
    %c1_132 = arith.constant 1 : index
    %c0_133 = arith.constant 0 : index
    %c0_134 = arith.constant 0 : index
    %300 = vector.load %arg4[%c0_131, %c1_132, %c0_133, %c0_134] : memref<1x8x4x128xf32, #tpu.memory_space<vmem>>, vector<1x1x4x128xf32>
    %301 = vector.shape_cast %300 : vector<1x1x4x128xf32> to vector<4x128xf32>
    %302 = vector.shape_cast %299 : vector<4x128xf32> to vector<1x1x4x128xf32>
    tpu.vector_store %arg4[%c0_131, %c1_132, %c0_133, %c0_134], %302 {strides = array<i32>} : memref<1x8x4x128xf32, #tpu.memory_space<vmem>>, vector<1x1x4x128xf32>,
    %c0_135 = arith.constant 0 : index
    %c2_136 = arith.constant 2 : index
    %c0_137 = arith.constant 0 : index
    %c0_138 = arith.constant 0 : index
    %303 = vector.load %arg4[%c0_135, %c2_136, %c0_137, %c0_138] : memref<1x8x4x128xf32, #tpu.memory_space<vmem>>, vector<1x1x4x128xf32>
    %304 = vector.shape_cast %303 : vector<1x1x4x128xf32> to vector<4x128xf32>
    %305 = arith.addf %304, %228 : vector<4x128xf32>
    %c0_139 = arith.constant 0 : index
    %c2_140 = arith.constant 2 : index
    %c0_141 = arith.constant 0 : index
    %c0_142 = arith.constant 0 : index
    %306 = vector.load %arg4[%c0_139, %c2_140, %c0_141, %c0_142] : memref<1x8x4x128xf32, #tpu.memory_space<vmem>>, vector<1x1x4x128xf32>
    %307 = vector.shape_cast %306 : vector<1x1x4x128xf32> to vector<4x128xf32>
    %308 = vector.shape_cast %305 : vector<4x128xf32> to vector<1x1x4x128xf32>
    tpu.vector_store %arg4[%c0_139, %c2_140, %c0_141, %c0_142], %308 {strides = array<i32>} : memref<1x8x4x128xf32, #tpu.memory_space<vmem>>, vector<1x1x4x128xf32>,
    %c0_143 = arith.constant 0 : index
    %c3_144 = arith.constant 3 : index
    %c0_145 = arith.constant 0 : index
    %c0_146 = arith.constant 0 : index
    %309 = vector.load %arg4[%c0_143, %c3_144, %c0_145, %c0_146] : memref<1x8x4x128xf32, #tpu.memory_space<vmem>>, vector<1x1x4x128xf32>
    %310 = vector.shape_cast %309 : vector<1x1x4x128xf32> to vector<4x128xf32>
    %311 = arith.addf %310, %286 : vector<4x128xf32>
    %c0_147 = arith.constant 0 : index
    %c3_148 = arith.constant 3 : index
    %c0_149 = arith.constant 0 : index
    %c0_150 = arith.constant 0 : index
    %312 = vector.load %arg4[%c0_147, %c3_148, %c0_149, %c0_150] : memref<1x8x4x128xf32, #tpu.memory_space<vmem>>, vector<1x1x4x128xf32>
    %313 = vector.shape_cast %312 : vector<1x1x4x128xf32> to vector<4x128xf32>
    %314 = vector.shape_cast %311 : vector<4x128xf32> to vector<1x1x4x128xf32>
    tpu.vector_store %arg4[%c0_147, %c3_148, %c0_149, %c0_150], %314 {strides = array<i32>} : memref<1x8x4x128xf32, #tpu.memory_space<vmem>>, vector<1x1x4x128xf32>,
    %c0_151 = arith.constant 0 : index
    %c4_152 = arith.constant 4 : index
    %c0_153 = arith.constant 0 : index
    %c0_154 = arith.constant 0 : index
    %315 = vector.load %arg4[%c0_151, %c4_152, %c0_153, %c0_154] : memref<1x8x4x128xf32, #tpu.memory_space<vmem>>, vector<1x1x4x128xf32>
    %316 = vector.shape_cast %315 : vector<1x1x4x128xf32> to vector<4x128xf32>
    %317 = arith.addf %316, %287 : vector<4x128xf32>
    %c0_155 = arith.constant 0 : index
    %c4_156 = arith.constant 4 : index
    %c0_157 = arith.constant 0 : index
    %c0_158 = arith.constant 0 : index
    %318 = vector.load %arg4[%c0_155, %c4_156, %c0_157, %c0_158] : memref<1x8x4x128xf32, #tpu.memory_space<vmem>>, vector<1x1x4x128xf32>
    %319 = vector.shape_cast %318 : vector<1x1x4x128xf32> to vector<4x128xf32>
    %320 = vector.shape_cast %317 : vector<4x128xf32> to vector<1x1x4x128xf32>
    tpu.vector_store %arg4[%c0_155, %c4_156, %c0_157, %c0_158], %320 {strides = array<i32>} : memref<1x8x4x128xf32, #tpu.memory_space<vmem>>, vector<1x1x4x128xf32>,
    %c0_159 = arith.constant 0 : index
    %c5_160 = arith.constant 5 : index
    %c0_161 = arith.constant 0 : index
    %c0_162 = arith.constant 0 : index
    %321 = vector.load %arg4[%c0_159, %c5_160, %c0_161, %c0_162] : memref<1x8x4x128xf32, #tpu.memory_space<vmem>>, vector<1x1x4x128xf32>
    %322 = vector.shape_cast %321 : vector<1x1x4x128xf32> to vector<4x128xf32>
    %323 = arith.addf %322, %288 : vector<4x128xf32>
    %c0_163 = arith.constant 0 : index
    %c5_164 = arith.constant 5 : index
    %c0_165 = arith.constant 0 : index
    %c0_166 = arith.constant 0 : index
    %324 = vector.load %arg4[%c0_163, %c5_164, %c0_165, %c0_166] : memref<1x8x4x128xf32, #tpu.memory_space<vmem>>, vector<1x1x4x128xf32>
    %325 = vector.shape_cast %324 : vector<1x1x4x128xf32> to vector<4x128xf32>
    %326 = vector.shape_cast %323 : vector<4x128xf32> to vector<1x1x4x128xf32>
    tpu.vector_store %arg4[%c0_163, %c5_164, %c0_165, %c0_166], %326 {strides = array<i32>} : memref<1x8x4x128xf32, #tpu.memory_space<vmem>>, vector<1x1x4x128xf32>,
    %c0_167 = arith.constant 0 : index
    %c6_168 = arith.constant 6 : index
    %c0_169 = arith.constant 0 : index
    %c0_170 = arith.constant 0 : index
    %327 = vector.load %arg4[%c0_167, %c6_168, %c0_169, %c0_170] : memref<1x8x4x128xf32, #tpu.memory_space<vmem>>, vector<1x1x4x128xf32>
    %328 = vector.shape_cast %327 : vector<1x1x4x128xf32> to vector<4x128xf32>
    %329 = arith.addf %328, %289 : vector<4x128xf32>
    %c0_171 = arith.constant 0 : index
    %c6_172 = arith.constant 6 : index
    %c0_173 = arith.constant 0 : index
    %c0_174 = arith.constant 0 : index
    %330 = vector.load %arg4[%c0_171, %c6_172, %c0_173, %c0_174] : memref<1x8x4x128xf32, #tpu.memory_space<vmem>>, vector<1x1x4x128xf32>
    %331 = vector.shape_cast %330 : vector<1x1x4x128xf32> to vector<4x128xf32>
    %332 = vector.shape_cast %329 : vector<4x128xf32> to vector<1x1x4x128xf32>
    tpu.vector_store %arg4[%c0_171, %c6_172, %c0_173, %c0_174], %332 {strides = array<i32>} : memref<1x8x4x128xf32, #tpu.memory_space<vmem>>, vector<1x1x4x128xf32>,
    %c0_175 = arith.constant 0 : index
    %c7_176 = arith.constant 7 : index
    %c0_177 = arith.constant 0 : index
    %c0_178 = arith.constant 0 : index
    %333 = vector.load %arg4[%c0_175, %c7_176, %c0_177, %c0_178] : memref<1x8x4x128xf32, #tpu.memory_space<vmem>>, vector<1x1x4x128xf32>
    %334 = vector.shape_cast %333 : vector<1x1x4x128xf32> to vector<4x128xf32>
    %335 = arith.addf %334, %290 : vector<4x128xf32>
    %c0_179 = arith.constant 0 : index
    %c7_180 = arith.constant 7 : index
    %c0_181 = arith.constant 0 : index
    %c0_182 = arith.constant 0 : index
    %336 = vector.load %arg4[%c0_179, %c7_180, %c0_181, %c0_182] : memref<1x8x4x128xf32, #tpu.memory_space<vmem>>, vector<1x1x4x128xf32>
    %337 = vector.shape_cast %336 : vector<1x1x4x128xf32> to vector<4x128xf32>
    %338 = vector.shape_cast %335 : vector<4x128xf32> to vector<1x1x4x128xf32>
    tpu.vector_store %arg4[%c0_179, %c7_180, %c0_181, %c0_182], %338 {strides = array<i32>} : memref<1x8x4x128xf32, #tpu.memory_space<vmem>>, vector<1x1x4x128xf32>,
    return
  }
  func.func @transform_0(%arg0: i32, %arg1: i32) -> (i32, i32, i32) {
    %c1_i32 = arith.constant 1 : i32
    %0 = arith.muli %arg0, %c1_i32 : i32
    %1 = arith.addi %0, %arg1 : i32
    %c0_i32 = arith.constant 0 : i32
    %c0_i32_0 = arith.constant 0 : i32
    %c0_i32_1 = arith.constant 0 : i32
    return %c0_i32, %1, %c0_i32_0 : i32, i32, i32
  }
  func.func @transform_1(%arg0: i32, %arg1: i32) -> (i32, i32, i32) {
    %c1_i32 = arith.constant 1 : i32
    %0 = arith.muli %arg0, %c1_i32 : i32
    %1 = arith.addi %0, %arg1 : i32
    %c0_i32 = arith.constant 0 : i32
    %c0_i32_0 = arith.constant 0 : i32
    %c0_i32_1 = arith.constant 0 : i32
    return %c0_i32, %1, %c0_i32_0 : i32, i32, i32
  }
  func.func @transform_2(%arg0: i32, %arg1: i32) -> (i32, i32, i32, i32) {
    %c0_i32 = arith.constant 0 : i32
    %c0_i32_0 = arith.constant 0 : i32
    %c0_i32_1 = arith.constant 0 : i32
    %c0_i32_2 = arith.constant 0 : i32
    return %arg0, %c0_i32, %c0_i32_0, %c0_i32_1 : i32, i32, i32, i32
  }
}

</mosaic_0001>

<bundles_post_ra>
// kernel: tpu_custom_call.1
= control target key start
LH: loop header
LB: loop body
LE: loop exit
PB: predicated region body
PF: predicated region fallthrough
CT: control target
= control target key end

     0   :  { %7 = vsyncpa [#allocation3], 0  ;;  %s532_s0 = inlined_call_operand.hbm [shape: bf16[12,4,128], index: 0, kind: input, shape index: {}]   ;;  %s533_s1 = inlined_call_operand.hbm [shape: bf16[11,4,128], index: 1, kind: input, shape index: {}]   ;;  %s534_s2 = inlined_call_operand.hbm [shape: f32[1,8,4,128], index: 2, kind: output, shape index: {}]  }
   0x1   :  { %8 = vsyncpa [#allocation6], 0 }
   0x2   :  { %9 = vsyncpa [#allocation4], 0  ;;  %s449_s9 = smov [#allocation2]   ;;  %s377_s13 = scalar_lea.hbm %s532_s0, 384 }
   0x3   :  { %s18_s10 = sshll.u32 %s449_s9, 4  ;;  %p378_p0 = scmp.ne.s32.totalorder %s532_s0, %s377_s13  ;;  %s19_s10 = int_to_ptr.vmem [resolvable:$true] %s18_s10 }
   0x4   :  { %p381_p1 = scmp.lt.u32.totalorder %s377_s13, %s532_s0 }
   0x6   :  { %p383_p2 = pnand %p381_p1, %p378_p0 }
   0x8   :  { %386 = shalt.err (!%p383_p2)
}
   0x9   :  { %s387_s18 = scalar_lea.vmem %s19_s10, 384  ;;  %p392_p4 = scmp.lt.s32.totalorder %s19_s10, %s19_s10 }
   0xa   :  { %p388_p3 = scmp.ne.s32.totalorder %s19_s10, %s387_s18  ;;  %p393_p5 = scmp.lt.s32.totalorder %s387_s18, %s387_s18 }
   0xc   :  { %p394_p6 = por %p393_p5, %p392_p4 }
   0xe   :  { %p395_p7 = pnand %p394_p6, %p388_p3 }
  0x10   :  { %398 = shalt.err (!%p395_p7)
}
  0x11   :  { %s450_s19 = smov 32   ;;  %s451_s20 = smov 2  }
  0x12   :  { %24 = dma.hbm_to_vmem [thread:$0]  %s532_s0, 384, %s19_s10, [#allocation3], %s450_s19, %s450_s19, %s451_s20  }
  0x13   :  { %s452_s23 = smov [#allocation5]   ;;  %s399_s27 = scalar_lea.hbm %s533_s1, 352 }
  0x14   :  { %s33_s24 = sshll.u32 %s452_s23, 4  ;;  %p400_p8 = scmp.ne.s32.totalorder %s533_s1, %s399_s27  ;;  %s34_s24 = int_to_ptr.vmem [resolvable:$true] %s33_s24 }
  0x15   :  { %p403_p9 = scmp.lt.u32.totalorder %s399_s27, %s533_s1 }
  0x17   :  { %p405_p10 = pnand %p403_p9, %p400_p8 }
  0x19   :  { %408 = shalt.err (!%p405_p10)
}
  0x1a   :  { %s409_s4 = scalar_lea.vmem %s34_s24, 352  ;;  %p414_p12 = scmp.lt.s32.totalorder %s34_s24, %s34_s24 }
  0x1b   :  { %p410_p11 = scmp.ne.s32.totalorder %s34_s24, %s409_s4  ;;  %p415_p13 = scmp.lt.s32.totalorder %s409_s4, %s409_s4 }
  0x1d   :  { %p416_p0 = por %p415_p13, %p414_p12 }
  0x1f   :  { %p417_p1 = pnand %p416_p0, %p410_p11 }
  0x21   :  { %420 = shalt.err (!%p417_p1)
}
  0x22   :  { %39 = dma.hbm_to_vmem [thread:$0]  %s533_s1, 352, %s34_s24, [#allocation6], %s450_s19, %s450_s19, %s451_s20  }
  0x23   :  { %443 = dma.done.wait [#allocation3], 384  }
  0x24   :  { %444 = vsyncadd [#allocation3], 4294966912 }
  0x25   :  { %445 = dma.done.wait [#allocation6], 352  }
  0x26   :  { %446 = vsyncadd [#allocation6], 4294966944  ;;  %v60_v0 = vlaneseq  ;;  %v453_v1 = vmov 0.0   ;;  %v80_v7 = vld [vmem:[#allocation5 + $0x8] sm:$0x3]  ;;  %s454_s1 = smov [#allocation7]  }
  0x27   :  { %52 = vst [vmem:[#allocation7] sm:$0xf] %v453_v1  ;;  %53 = vst [vmem:[#allocation7 + $0x4] sm:$0xf] %v453_v1  ;;  %v85_v8 = vld [vmem:[#allocation2 + $0x8] sm:$0x3]  ;;  %v496_v9 = vunpack.c.l.bf16 %v80_v7 }
  0x28   :  { %54 = vst [vmem:[#allocation7 + $0x8] sm:$0xf] %v453_v1  ;;  %55 = vst [vmem:[#allocation7 + $0xc] sm:$0xf] %v453_v1  ;;  %v61_v2 = vshrl.u32 %v60_v0, 7  ;;  %v63_v3 = vand.u32 127, %v60_v0  ;;  %v86_v10 = vunpack.c.l.bf16 %v85_v8 }
  0x29   :  { %56 = vst [vmem:[#allocation7 + $0x10] sm:$0xf] %v453_v1  ;;  %57 = vst [vmem:[#allocation7 + $0x14] sm:$0xf] %v453_v1  ;;  %v113_v11 = vld [vmem:[#allocation2 + $0xa] sm:$0x3] }
  0x2a   :  { %58 = vst [vmem:[#allocation7 + $0x18] sm:$0xf] %v453_v1  ;;  %59 = vst [vmem:[#allocation7 + $0x1c] sm:$0xf] %v453_v1  ;;  %v64_v4 = vcvt.s32.f32 %v61_v2  ;;  %v67_v5 = vcvt.s32.f32 %v63_v3  ;;  %v114_v14 = vunpack.c.l.bf16 %v113_v11  ;;  %vm82_vm0 = vcmp.gt.f32.partialorder %v496_v9, 0.5  ;;  %s324_s6 = sshll.u32 %s454_s1, 4  ;;  %s325_s6 = int_to_ptr.vmem [resolvable:$true] %s324_s6 }
  0x2b   :  { %v87_v15 = vsub.f32 0.0, %v86_v10  ;;  %v499_v16 = vsel %vm82_vm0, 1.0, %v453_v1  ;;  %v154_v21 = vld [vmem:[#allocation2] sm:$0x3]  ;;  %v164_v24 = vld [vmem:[#allocation2 + $0x2] sm:$0x3]  ;;  %p426_p3 = scmp.lt.s32.totalorder %s325_s6, %s325_s6 }
  0x2c   :  { %v65_v6 = vmul.f32 128.0, %v64_v4  ;;  %v115_v17 = vsub.f32 0.0, %v114_v14  ;;  %v174_v25 = vld [vmem:[#allocation2 + $0x4] sm:$0x3]  ;;  %v181_v26 = vld [vmem:[#allocation2 + $0x6] sm:$0x3]  ;;  %v155_v28 = vunpack.c.l.bf16 %v154_v21  ;;  %v165_v30 = vunpack.c.l.bf16 %v164_v24 }
  0x2d   :  { %v88_v20 = vmul.f32 1.442695, %v87_v15  ;;  %v230_v29 = vld [vmem:[#allocation2 + $0xc] sm:$0x3]  ;;  %v175_v31 = vunpack.c.l.bf16 %v174_v25  ;;  %v182_v34 = vunpack.c.l.bf16 %v181_v26  ;;  %v233_v35 = vld [vmem:[#allocation5 + $0xc] sm:$0x3] }
  0x2e   :  { %v68_v12 = vadd.f32 %v67_v5, %v65_v6  ;;  %v288_v13 = vld [vmem:[#allocation7] sm:$0xf]  ;;  %v116_v22 = vmul.f32 1.442695, %v115_v17  ;;  %v156_v33 = vsub.f32 0.0, %v155_v28  ;;  %v166_v37 = vsub.f32 0.0, %v165_v30 }
  0x2f   :  { %v289_v19 = vadd.f32 %v288_v13, %v499_v16  ;;  %345 = vpow2.f32 %v88_v20  ;;  %v238_v36 = vld [vmem:[#allocation2 + $0xe] sm:$0x3]  ;;  %v176_v38 = vmin.f32 %v175_v31, 20.0  ;;  %v231_v39 = vunpack.c.l.bf16 %v230_v29  ;;  %v241_v40 = vld [vmem:[#allocation5 + $0xe] sm:$0x3]  ;;  %s421_s7 = scalar_lea.vmem %s325_s6, 512 }
  0x30   :  { %v69_v18 = vmul.f32 0.00390625, %v68_v12  ;;  %347 = vpow2.f32 %v116_v22  ;;  %v157_v42 = vmul.f32 1.442695, %v156_v33  ;;  %v265_v43 = vld [vmem:[#allocation2 + $0x14] sm:$0x3]  ;;  %v183_v46 = vmin.f32 %v182_v34, 20.0  ;;  %p422_p2 = scmp.ne.s32.totalorder %s325_s6, %s421_s7  ;;  %p427_p4 = scmp.lt.s32.totalorder %s421_s7, %s421_s7 }
  0x31   :  { %290 = vst [vmem:[#allocation7] sm:$0xf] %v289_v19  ;;  %v268_v44 = vld [vmem:[#allocation5 + $0x12] sm:$0x3]  ;;  %v167_v45 = vmul.f32 1.442695, %v166_v37  ;;  %v234_v47 = vunpack.c.l.bf16 %v233_v35  ;;  %v239_v48 = vunpack.c.l.bf16 %v238_v36  ;;  %v242_v52 = vunpack.c.l.bf16 %v241_v40 }
  0x32   :  { %v70_v23 = vadd.f32 0.001953125, %v69_v18  ;;  %v272_v49 = vld [vmem:[#allocation2 + $0x16] sm:$0x3]  ;;  %349 = vpow2.f32 %v157_v42  ;;  %v177_v51 = vmul.f32 1.442695, %v176_v38  ;;  %v266_v55 = vunpack.c.l.bf16 %v265_v43  ;;  %p428_p5 = por %p427_p4, %p426_p3 }
  0x33   :  { %v275_v53 = vld [vmem:[#allocation5 + $0x14] sm:$0x3]  ;;  %351 = vpow2.f32 %v167_v45  ;;  %v235_v54 = vsub.f32 %v231_v39, %v234_v47  ;;  %v269_v56 = vunpack.c.l.bf16 %v268_v44  ;;  %v243_v58 = vsub.f32 %v239_v48, %v242_v52  ;;  %v300_v4 = vld [vmem:[#allocation7 + $0xc] sm:$0xf]  ;;  %v304_v13 = vld [vmem:[#allocation7 + $0x10] sm:$0xf] }
  0x34   :  { %v71_v27 = vfloor.f32 %v70_v23  ;;  %v273_v59 = vunpack.c.l.bf16 %v272_v49  ;;  %v184_v61 = vmul.f32 1.442695, %v183_v46  ;;  %v276_v0 = vunpack.c.l.bf16 %v275_v53  ;;  %v255_v14 = vld [vmem:[#allocation2 + $0x12] sm:$0x3]  ;;  %v110_v15 = vld [vmem:[#allocation5 + $0xa] sm:$0x3]  ;;  %p429_p6 = pnand %p428_p5, %p422_p2 }
  0x35   :  { %v236_v62 = vand.u32 2147483647, %v235_v54  ;;  %v270_v63 = vsub.f32 %v266_v55, %v269_v56  ;;  %353 = vpow2.f32 %v177_v51  ;;  %v244_v5 = vand.u32 2147483647, %v243_v58  ;;  %v137_v17 = vld [vmem:[#allocation5] sm:$0x3] }
  0x36   :  { %v72_v32 = vmul.f32 256.0, %v71_v27  ;;  %v277_v8 = vsub.f32 %v273_v59, %v276_v0  ;;  %v147_v18 = vld [vmem:[#allocation5 + $0x4] sm:$0x3]  ;;  %v256_v25 = vunpack.c.l.bf16 %v255_v14  ;;  %v111_v27 = vunpack.c.l.bf16 %v110_v15  ;;  %v308_v31 = vld [vmem:[#allocation7 + $0x14] sm:$0xf] }
  0x37   :  { %v283_v7 = vmul.f32 %v236_v62, %v499_v16  ;;  %v278_v10 = vmul.f32 %v270_v63, %v270_v63  ;;  %v284_v20 = vmul.f32 %v244_v5, %v499_v16  ;;  %v138_v29 = vunpack.c.l.bf16 %v137_v17  ;;  %v142_v33 = vld [vmem:[#allocation5 + $0x2] sm:$0x3]  ;;  %v151_v34 = vld [vmem:[#allocation5 + $0x6] sm:$0x3]  ;;  %v316_v40 = vld [vmem:[#allocation7 + $0x1c] sm:$0xf] }
  0x38   :  { %v73_v41 = vsub.f32 %v68_v12, %v72_v32  ;;  %v245_v12 = vadd.f32 %v244_v5, %v236_v62  ;;  %v279_v21 = vmul.f32 %v277_v8, %v277_v8  ;;  %v148_v30 = vunpack.c.l.bf16 %v147_v18 }
  0x39   :  { %v346_v60 = vpop.eup %345  ;;  %v301_v19 = vadd.f32 %v300_v4, %v283_v7  ;;  %v305_v23 = vadd.f32 %v304_v13, %v284_v20  ;;  %v257_v37 = vsub.f32 0.0, %v256_v25  ;;  %v93_v42 = vsub.f32 1.0, %v496_v9  ;;  %v248_v25 = vld [vmem:[#allocation2 + $0x10] sm:$0x3] }
  0x3a   :  { %v74_v50 = vmul.f32 0.0625, %v73_v41  ;;  %v348_v1 = vpop.eup %347  ;;  %v90_v2 = vadd.f32 1.0, %v346_v60  ;;  %v507_v22 = vmul.f32 0.5, %v245_v12  ;;  %v280_v24 = vadd.f32 %v279_v21, %v278_v10 }
  0x3b   :  { %v118_v6 = vadd.f32 1.0, %v348_v1  ;;  %302 = vst [vmem:[#allocation7 + $0xc] sm:$0xf] %v301_v19  ;;  %306 = vst [vmem:[#allocation7 + $0x10] sm:$0xf] %v305_v23  ;;  %v121_v45 = vsub.f32 1.0, %v111_v27  ;;  %v143_v46 = vunpack.c.l.bf16 %v142_v33  ;;  %v152_v47 = vunpack.c.l.bf16 %v151_v34 }
  0x3c   :  { %v75_v57 = vadd.f32 0.03125, %v74_v50  ;;  %355 = vrcp.f32 %v90_v2  ;;  %v350_v26 = vpop.eup %349  ;;  %v285_v36 = vmul.f32 %v280_v24, %v499_v16  ;;  %v287_v38 = vmul.f32 %v507_v22, %v499_v16 }
  0x3d   :  { %357 = vrcp.f32 %v118_v6  ;;  %v352_v32 = vpop.eup %351  ;;  %v159_v35 = vadd.f32 1.0, %v350_v26  ;;  %v258_v43 = vmul.f32 1.442695, %v257_v37  ;;  %v149_v49 = vmul.f32 4.0, %v148_v30 }
  0x3e   :  { %v502_v3 = vfloor.f32 %v75_v57  ;;  %359 = vpow2.f32 %v184_v61  ;;  %v169_v39 = vadd.f32 1.0, %v352_v32  ;;  %v317_v50 = vadd.f32 %v316_v40, %v287_v38 }
  0x3f   :  { %361 = vrcp.f32 %v159_v35  ;;  %v354_v44 = vpop.eup %353  ;;  %v97_v52 = vmul.f32 0.2, %v496_v9  ;;  %v98_v56 = vmul.f32 0.8, %v93_v42  ;;  %v125_v57 = vmul.f32 0.0, %v121_v45 }
  0x40   :  { %v77_v11 = vmul.f32 16.0, %v502_v3  ;;  %363 = vrcp.f32 %v169_v39  ;;  %318 = vst [vmem:[#allocation7 + $0x1c] sm:$0xf] %v317_v50  ;;  %v144_v61 = vadd.f32 %v143_v46, %v502_v3  ;;  %v153_v62 = vmul.f32 4.0, %v152_v47 }
  0x41   :  { %365 = vpow2.f32 %v258_v43  ;;  %v187_v1 = vmul.f32 0.5, %v149_v49  ;;  %v179_v4 = vmul.f32 4.0, %v354_v44  ;;  %v99_v6 = vadd.f32 %v98_v56, %v97_v52 }
  0x42   :  { %v78_v28 = vsub.f32 %v73_v41, %v77_v11  ;;  %v309_v41 = vadd.f32 %v308_v31, %v285_v36  ;;  %v126_v7 = vadd.f32 %v125_v57, %v111_v27  ;;  %v145_v10 = vmul.f32 4.0, %v144_v61  ;;  %v251_v31 = vld [vmem:[#allocation5 + $0x10] sm:$0x3] }
  0x43   :  { %v190_v11 = vmul.f32 0.5, %v153_v62  ;;  %v208_v12 = vmul.f32 %v153_v62, %v149_v49  ;;  %v193_v24 = vmul.f32 0.5, %v179_v4  ;;  %v249_v38 = vunpack.c.l.bf16 %v248_v25 }
  0x44   :  { %v139_v48 = vadd.f32 %v138_v29, %v78_v28  ;;  %310 = vst [vmem:[#allocation7 + $0x14] sm:$0xf] %v309_v41 }
  0x45   :  { %v191_v36 = vsub.f32 %v145_v10, %v190_v11  ;;  %v192_v37 = vadd.f32 %v190_v11, %v145_v10 }
  0x46   :  { %v356_v51 = vpop.eup %355  ;;  %v140_v0 = vmul.f32 4.0, %v139_v48 }
  0x47   :  { %v358_v53 = vpop.eup %357  ;;  %v92_v54 = vmul.f32 %v356_v51, %v496_v9  ;;  %v94_v55 = vsub.f32 1.0, %v356_v51 }
  0x48   :  { %v360_v58 = vpop.eup %359  ;;  %v120_v59 = vmul.f32 %v358_v53, %v111_v27  ;;  %v122_v60 = vsub.f32 1.0, %v358_v53  ;;  %v188_v17 = vsub.f32 %v140_v0, %v187_v1  ;;  %v189_v18 = vadd.f32 %v187_v1, %v140_v0 }
  0x49   :  { %v95_v63 = vmul.f32 %v94_v55, %v93_v42  ;;  %v186_v8 = vmul.f32 4.0, %v360_v58  ;;  %v362_v13 = vpop.eup %361 }
  0x4a   :  { %v123_v2 = vmul.f32 %v122_v60, %v121_v45  ;;  %v364_v19 = vpop.eup %363  ;;  %v161_v23 = vadd.f32 %v362_v13, %v78_v28  ;;  %v252_v28 = vunpack.c.l.bf16 %v251_v31 }
  0x4b   :  { %v96_v5 = vadd.f32 %v95_v63, %v92_v54  ;;  %v366_v26 = vpop.eup %365  ;;  %v171_v27 = vadd.f32 %v364_v19, %v502_v3  ;;  %v196_v30 = vmul.f32 0.5, %v186_v8  ;;  %v209_v44 = vmul.f32 %v186_v8, %v179_v4 }
  0x4c   :  { %v124_v9 = vadd.f32 %v123_v2, %v120_v59  ;;  %v162_v33 = vmul.f32 4.0, %v161_v23  ;;  %v260_v34 = vadd.f32 1.0, %v366_v26  ;;  %v253_v63 = vsub.f32 %v249_v38, %v252_v28 }
  0x4d   :  { %v100_v14 = vsub.f32 1.0, %v96_v5  ;;  %v104_v15 = vmax.f32 %v96_v5, 1e-06  ;;  %v172_v35 = vmul.f32 4.0, %v171_v27  ;;  %v210_v62 = vadd.f32 %v209_v44, %v208_v12 }
  0x4e   :  { %v127_v20 = vsub.f32 1.0, %v124_v9  ;;  %v131_v21 = vmax.f32 %v124_v9, 1e-06  ;;  %v194_v39 = vsub.f32 %v162_v33, %v193_v24  ;;  %v195_v40 = vadd.f32 %v193_v24, %v162_v33  ;;  %v296_v33 = vld [vmem:[#allocation7 + $0x8] sm:$0xf] }
  0x4f   :  { %v101_v29 = vmul.f32 %v100_v14, %v100_v14  ;;  %367 = vlog2.f32 %v104_v15  ;;  %v197_v41 = vsub.f32 %v172_v35, %v196_v30  ;;  %v198_v43 = vadd.f32 %v196_v30, %v172_v35 }
  0x50   :  { %v128_v32 = vmul.f32 %v127_v20, %v127_v20  ;;  %369 = vlog2.f32 %v131_v21  ;;  %v199_v3 = vmin.f32 %v189_v18, %v195_v40  ;;  %v200_v46 = vmax.f32 %v188_v17, %v194_v39  ;;  %v312_v20 = vld [vmem:[#allocation7 + $0x18] sm:$0xf] }
  0x51   :  { %371 = vrcp.f32 %v260_v34  ;;  %v102_v42 = vmul.f32 %v101_v29, %v101_v29  ;;  %v215_v47 = vmax.f32 %v189_v18, %v195_v40  ;;  %v203_v48 = vmin.f32 %v192_v37, %v198_v43 }
  0x52   :  { %v129_v45 = vmul.f32 %v128_v32, %v128_v32  ;;  %v204_v49 = vmax.f32 %v191_v36, %v197_v41  ;;  %v216_v50 = vmin.f32 %v188_v17, %v194_v39  ;;  %v218_v51 = vmax.f32 %v192_v37, %v198_v43 }
  0x53   :  { %v201_v52 = vsub.f32 %v199_v3, %v200_v46  ;;  %v219_v53 = vmin.f32 %v191_v36, %v197_v41  ;;  %v103_v56 = vmul.f32 %v102_v42, %v99_v6 }
  0x54   :  { %v205_v54 = vsub.f32 %v203_v48, %v204_v49  ;;  %v217_v55 = vsub.f32 %v215_v47, %v216_v50  ;;  %v130_v60 = vmul.f32 %v129_v45, %v126_v7  ;;  %v292_v7 = vld [vmem:[#allocation7 + $0x4] sm:$0xf] }
  0x55   :  { %v202_v57 = vmax.f32 %v201_v52, 0.0  ;;  %v220_v58 = vsub.f32 %v218_v51, %v219_v53 }
  0x56   :  { %v206_v61 = vmax.f32 %v205_v54, 0.0 }
  0x57   :  { %v221_v2 = vmul.f32 %v220_v58, %v217_v55 }
  0x58   :  { %v207_v5 = vmul.f32 %v206_v61, %v202_v57 }
  0x59   :  { %v368_v59 = vpop.eup %367  ;;  %v222_v10 = vadd.f32 1e-06, %v221_v2 }
  0x5a   :  { %v370_v0 = vpop.eup %369  ;;  %v106_v1 = vmul.f32 0.6931472, %v368_v59  ;;  %v211_v13 = vsub.f32 %v210_v62, %v207_v5 }
  0x5b   :  { %v133_v4 = vmul.f32 0.6931472, %v370_v0  ;;  %v372_v8 = vpop.eup %371  ;;  %373 = vrcp.f32 %v222_v10 }
  0x5c   :  { %v107_v9 = vmul.f32 %v106_v1, %v103_v56  ;;  %v262_v14 = vmul.f32 %v372_v8, %v253_v63  ;;  %v212_v17 = vadd.f32 1e-06, %v211_v13 }
  0x5d   :  { %v134_v11 = vmul.f32 %v133_v4, %v130_v60 }
  0x5e   :  { %v108_v15 = vsub.f32 0.0, %v107_v9  ;;  %v263_v18 = vmul.f32 %v262_v14, %v253_v63  ;;  %375 = vrcp.f32 %v212_v17  ;;  %v223_v25 = vsub.f32 %v222_v10, %v212_v17 }
  0x5f   :  { %v135_v6 = vsub.f32 0.0, %v134_v11 }
  0x60   :  { %vm281_vm1 = vcmp.gt.f32.partialorder %v263_v18, 0.0 }
  0x61   :  { %v136_v19 = vadd.f32 %v135_v6, %v108_v15  ;;  %v282_v12 = vsel %vm281_vm1, %v263_v18, %v507_v22 }
  0x62   :  { %v286_v23 = vmul.f32 %v282_v12, %v499_v16 }
  0x63   :  { %v293_v21 = vadd.f32 %v292_v7, %v136_v19 }
  0x64   :  { %v313_v24 = vadd.f32 %v312_v20, %v286_v23 }
  0x65   :  { %294 = vst [vmem:[#allocation7 + $0x4] sm:$0xf] %v293_v21  ;;  %v374_v26 = vpop.eup %373 }
  0x66   :  { %314 = vst [vmem:[#allocation7 + $0x18] sm:$0xf] %v313_v24  ;;  %v225_v29 = vmul.f32 %v374_v26, %v223_v25 }
  0x68   :  { %v376_v27 = vpop.eup %375 }
  0x69   :  { %v214_v30 = vmul.f32 %v376_v27, %v207_v5 }
  0x6b   :  { %v226_v31 = vsub.f32 %v214_v30, %v225_v29 }
  0x6d   :  { %v227_v32 = vsub.f32 1.0, %v226_v31 }
  0x6f   :  { %v228_v34 = vmul.f32 %v227_v32, %v499_v16 }
  0x71   :  { %v297_v22 = vadd.f32 %v296_v33, %v228_v34 }
  0x73   :  { %298 = vst [vmem:[#allocation7 + $0x8] sm:$0xf] %v297_v22 }
  0x74   :  { %432 = shalt.err (!%p429_p6)
}
  0x75   :  { %s433_s10 = scalar_lea.hbm %s534_s2, 512 }
  0x76   :  { %p434_p7 = scmp.ne.s32.totalorder %s534_s2, %s433_s10  ;;  %p437_p8 = scmp.lt.u32.totalorder %s433_s10, %s534_s2 }
  0x78   :  { %p439_p9 = pnand %p437_p8, %p434_p7 }
  0x7a   :  { %442 = shalt.err (!%p439_p9)
}
  0x7b   :  { %s455_s15 = smov 64   ;;  %s456_s16 = smov 4  }
  0x7c   :  { %330 = dma.vmem_to_hbm [thread:$0]  %s325_s6, 512, %s534_s2, [#allocation4], %s455_s15, %s455_s15, %s456_s16  }
  0x7d   :  { %447 = dma.done.wait [#allocation4], 512  }
  0x7e   :  { %448 = vsyncadd [#allocation4], 4294966784 }
  0x7f   :  { %334 = vsyncpa [#allocation3], 1 }
  0x80   :  { %335 = vsyncpa [#allocation6], 1 }
  0x81   :  { %336 = vsyncpa [#allocation4], 1 }

</bundles_post_ra>
